<compile_context>
chip_gen: v5e
topology: v5e:2x2
jax: 0.10.0
libtpu: 0.0.40
codegen_flags: <defaults>
</compile_context>

<pallas_src>
import numpy as np
import jax
import jax.numpy as jnp
from jax import lax
from jax.experimental import pallas as pl
from jax.experimental.pallas import tpu as pltpu


# ----------------------------------------------------------------------------
# Fused conv stage: branches (+ReLU) -> final conv (+ReLU) -> LSTM input proj.
# Grid over batch ("parallel"); everything stays in VMEM; output = gates_x.
# ----------------------------------------------------------------------------
def _make_conv_gates_kernel(L, conv_kernels, n_filters, pmax):
    n_branch = len(conv_kernels)

    def kernel(*refs):
        xp_ref = refs[0]                                    # (1, L+2*pmax, F) f32
        branch_refs = refs[1:1 + 2 * n_branch]              # (k,F,nf) bf16 / (1,nf) f32 pairs
        wf_ref, bfin_ref, wih_ref, bg_ref = refs[1 + 2 * n_branch:5 + 2 * n_branch]
        gates_ref = refs[-2]                                # (1, L, 8H) f32 output
        cpad_ref = refs[-1]                                 # (L+2, c_cat) f32 scratch

        n_out = wf_ref.shape[2]                             # 128

        # --- parallel Conv1d branches (+ReLU), concatenated on channels ------
        branch_outs = []
        for bi, k in enumerate(conv_kernels):
            w_ref = branch_refs[2 * bi]
            b_ref = branch_refs[2 * bi + 1]
            p = k // 2
            acc = jnp.zeros((L, n_filters), jnp.float32)
            for t in range(k):                              # k is small & static
                xs = xp_ref[0, pl.ds(pmax - p + t, L), :].astype(jnp.bfloat16)
                acc = acc + jnp.dot(xs, w_ref[t], preferred_element_type=jnp.float32)
            branch_outs.append(jnp.maximum(acc + b_ref[...], 0.0))
        ccat = jnp.concatenate(branch_outs, axis=-1)        # (L, c_cat) f32

        # zero-padded (by 1) copy of the concat for the k=3 final conv
        cpad_ref[...] = jnp.zeros(cpad_ref.shape, cpad_ref.dtype)
        cpad_ref[pl.ds(1, L), :] = ccat

        # --- final Conv1d(c_cat -> 128, k=3, pad=1) + ReLU --------------------
        acc2 = jnp.zeros((L, n_out), jnp.float32)
        for t in range(3):
            cs = cpad_ref[pl.ds(t, L), :].astype(jnp.bfloat16)
            acc2 = acc2 + jnp.dot(cs, wf_ref[t], preferred_element_type=jnp.float32)
        x = jnp.maximum(acc2 + bfin_ref[...], 0.0).astype(jnp.bfloat16)   # (L, 128)

        # --- LSTM input projection (both directions): (L,128) @ (128,8H) -----
        gates = jnp.dot(x, wih_ref[...], preferred_element_type=jnp.float32)
        gates_ref[0, :, :] = gates + bg_ref[...]

    return kernel


def conv_gates(x_emb_padded, L, kp):
    """x_emb_padded: (B, L+2*pmax, F) f32 (halo rows are zero). Returns (B, L, 8H) f32."""
    B, Lp, F = x_emb_padded.shape
    convs = kp["convs"]
    conv_ks = tuple(int(w.shape[0]) for (w, _) in convs)
    n_filters = int(convs[0][0].shape[2])
    pmax = max(conv_ks) // 2
    c_cat = len(convs) * n_filters
    final_w, final_b = kp["final_w"], kp["final_b"]
    wih_cat, bias_g = kp["wih_cat"], kp["bias_g"]
    cout = int(final_w.shape[2])
    h8 = int(wih_cat.shape[1])

    kernel = _make_conv_gates_kernel(L, conv_ks, n_filters, pmax)

    in_specs = [pl.BlockSpec((1, Lp, F), lambda i: (i, 0, 0))]
    inputs = [x_emb_padded]
    for (w, b) in convs:
        k = int(w.shape[0])
        in_specs.append(pl.BlockSpec((k, F, n_filters), lambda i: (0, 0, 0)))
        in_specs.append(pl.BlockSpec((1, n_filters), lambda i: (0, 0)))
        inputs += [w, b]
    in_specs += [
        pl.BlockSpec((3, c_cat, cout), lambda i: (0, 0, 0)),
        pl.BlockSpec((1, cout), lambda i: (0, 0)),
        pl.BlockSpec((cout, h8), lambda i: (0, 0)),
        pl.BlockSpec((1, h8), lambda i: (0, 0)),
    ]
    inputs += [final_w, final_b, wih_cat, bias_g]

    return pl.pallas_call(
        kernel,
        out_shape=jax.ShapeDtypeStruct((B, L, h8), jnp.float32),
        grid=(B,),
        in_specs=in_specs,
        out_specs=pl.BlockSpec((1, L, h8), lambda i: (i, 0, 0)),
        scratch_shapes=[pltpu.VMEM((L + 2, c_cat), jnp.float32)],
        compiler_params=pltpu.CompilerParams(dimension_semantics=("parallel",)),
    )(*inputs)


# ----------------------------------------------------------------------------
# Batched bidirectional LSTM recurrence. Input projection is precomputed
# (gates_x = x @ [Wih_f|Wih_b] + bih + bhh), so each timestep only does the
# (B,H)x(H,4H) recurrent matmul per direction. Length masking reproduces
# pack_padded semantics (padded positions -> 0, carries frozen).
# ----------------------------------------------------------------------------
def _make_bilstm_kernel(T, H, Bt):
    def kernel(lens_ref, gates_ref, whhf_ref, whhb_ref, out_ref):
        lenv = lens_ref[...]                                 # (Bt, 1) int32
        whhf = whhf_ref[...]                                 # (H, 4H) bf16
        whhb = whhb_ref[...]

        def cell(gx, h, c, whh):
            gates = gx + jnp.dot(h.astype(jnp.bfloat16), whh,
                                 preferred_element_type=jnp.float32)
            i = jax.nn.sigmoid(gates[:, 0:H])
            f = jax.nn.sigmoid(gates[:, H:2 * H])
            g = jnp.tanh(gates[:, 2 * H:3 * H])
            o = jax.nn.sigmoid(gates[:, 3 * H:4 * H])
            c_new = f * c + i * g
            h_new = o * jnp.tanh(c_new)
            return h_new, c_new

        zeros = jnp.zeros((Bt, H), jnp.float32)

        def step(s, carry):
            h_f, c_f, h_b, c_b = carry
            t_f = s
            t_b = T - 1 - s

            gx_f = gates_ref[:, pl.ds(t_f, 1), pl.ds(0, 4 * H)].reshape(Bt, 4 * H)
            gx_b = gates_ref[:, pl.ds(t_b, 1), pl.ds(4 * H, 4 * H)].reshape(Bt, 4 * H)

            hf_new, cf_new = cell(gx_f, h_f, c_f, whhf)
            hb_new, cb_new = cell(gx_b, h_b, c_b, whhb)

            valid_f = t_f < lenv                             # (Bt, 1) bool
            valid_b = t_b < lenv

            out_ref[:, pl.ds(t_f, 1), pl.ds(0, H)] = (
                jnp.where(valid_f, hf_new, 0.0).reshape(Bt, 1, H))
            out_ref[:, pl.ds(t_b, 1), pl.ds(H, H)] = (
                jnp.where(valid_b, hb_new, 0.0).reshape(Bt, 1, H))

            h_f = jnp.where(valid_f, hf_new, h_f)
            c_f = jnp.where(valid_f, cf_new, c_f)
            h_b = jnp.where(valid_b, hb_new, h_b)
            c_b = jnp.where(valid_b, cb_new, c_b)
            return h_f, c_f, h_b, c_b

        lax.fori_loop(0, T, step, (zeros, zeros, zeros, zeros))

    return kernel


def bilstm(gates_x, seq_lengths, whh_f, whh_b, n_hid):
    """gates_x: (B, T, 8H) f32; returns (B, T, 2H) f32 (fwd in [:H], bwd in [H:])."""
    B, T, H8 = gates_x.shape
    H = n_hid
    assert H8 == 8 * H
    Bt = B                                                   # whole batch in one grid step
    lens2d = seq_lengths.astype(jnp.int32).reshape(B, 1)

    kernel = _make_bilstm_kernel(T, H, Bt)
    return pl.pallas_call(
        kernel,
        out_shape=jax.ShapeDtypeStruct((B, T, 2 * H), jnp.float32),
        grid=(pl.cdiv(B, Bt),),
        in_specs=[
            pl.BlockSpec((Bt, 1), lambda i: (i, 0)),
            pl.BlockSpec((Bt, T, H8), lambda i: (i, 0, 0)),
            pl.BlockSpec((H, 4 * H), lambda i: (0, 0)),
            pl.BlockSpec((H, 4 * H), lambda i: (0, 0)),
        ],
        out_specs=pl.BlockSpec((Bt, T, 2 * H), lambda i: (i, 0, 0)),
        compiler_params=pltpu.CompilerParams(dimension_semantics=("parallel",)),
    )(lens2d, gates_x, whh_f, whh_b)


# ----------------------------------------------------------------------------
# Parameter prep (torch layout -> kernel layout, MXU weights in bf16).
# ----------------------------------------------------------------------------
def prepare_params(params):
    for (w, _) in params["convs"]:
        assert int(w.shape[2]) % 2 == 1, "even conv kernels change the sequence length"
    convs = [(jnp.transpose(w, (2, 1, 0)).astype(jnp.bfloat16),       # (k, Cin, Cout)
              b.reshape(1, -1).astype(jnp.float32))
             for (w, b) in params["convs"]]
    final_w = jnp.transpose(params["cnn_final_w"], (2, 1, 0)).astype(jnp.bfloat16)
    final_b = params["cnn_final_b"].reshape(1, -1).astype(jnp.float32)
    (wih_f, whh_f, bih_f, bhh_f, wih_b, whh_b, bih_b, bhh_b) = params["lstm"]
    wih_cat = jnp.concatenate([wih_f.T, wih_b.T], axis=1).astype(jnp.bfloat16)   # (128, 8H)
    bias_g = jnp.concatenate([bih_f + bhh_f, bih_b + bhh_b]).reshape(1, -1).astype(jnp.float32)
    return {
        "embed": params["embed"].astype(jnp.float32),
        "convs": convs,
        "final_w": final_w, "final_b": final_b,
        "wih_cat": wih_cat, "bias_g": bias_g,
        "whh_f": whh_f.T.astype(jnp.bfloat16),               # (H, 4H)
        "whh_b": whh_b.T.astype(jnp.bfloat16),
        "n_hid": int(whh_f.shape[1]),
    }


# ----------------------------------------------------------------------------
# Full encoder forward (glue in plain JAX, hot paths in Pallas).
# ----------------------------------------------------------------------------
def encoder_forward(inp, seq_lengths, kp):
    B, L = inp.shape
    conv_ks = tuple(int(w.shape[0]) for (w, _) in kp["convs"])
    pmax = max(conv_ks) // 2
    # Build the conv halo inside the embedding gather: halo tokens use padding
    # index 20, whose embedding row is zero -> no separate jnp.pad pass over HBM.
    pad_ids = jnp.full((B, pmax), 20, jnp.int32)
    inp_p = jnp.concatenate([pad_ids, inp.astype(jnp.int32), pad_ids], axis=1)
    x_emb = jnp.take(kp["embed"], inp_p, axis=0)             # (B, L+2*pmax, F) f32
    # TODO(synk): nn.Dropout / nn.Dropout2d are identity in eval mode; stochastic
    # training-mode dropout is not implemented.
    gates_x = conv_gates(x_emb, L, kp)                       # (B, L, 8H)
    return bilstm(gates_x, seq_lengths, kp["whh_f"], kp["whh_b"], kp["n_hid"])


# ----------------------------------------------------------------------------
# Pure numpy reference (mirrors PyTorch semantics) for correctness checking.
# ----------------------------------------------------------------------------
def _sigmoid(z):
    return 1.0 / (1.0 + np.exp(-z))


def ref_forward(inp, lens, params, n_hid):
    p = jax.tree_util.tree_map(np.asarray, params)
    emb = p["embed"][np.asarray(inp)]                        # (B, L, F)

    def conv_relu_np(x, w, bias):
        B, L, Cin = x.shape
        Cout, _, k = w.shape
        pad = k // 2
        xp = np.pad(x, ((0, 0), (pad, pad), (0, 0)))
        acc = np.zeros((B, L, Cout), np.float32)
        for t in range(k):
            acc += xp[:, t:t + L, :] @ w[:, :, t].T
        return np.maximum(acc + bias, 0.0)

    branches = [conv_relu_np(emb, w, b) for (w, b) in p["convs"]]
    conv_cat = np.concatenate(branches, axis=-1)
    x = conv_relu_np(conv_cat, p["cnn_final_w"], p["cnn_final_b"])

    B, T, D = x.shape
    H = n_hid
    wih_f, whh_f, bih_f, bhh_f, wih_b, whh_b, bih_b, bhh_b = p["lstm"]
    out = np.zeros((B, T, 2 * H), np.float32)
    for bi in range(B):
        Lb = int(lens[bi])
        h = np.zeros(H, np.float32); c = np.zeros(H, np.float32)
        for t in range(Lb):
            gates = wih_f @ x[bi, t] + bih_f + whh_f @ h + bhh_f
            i = _sigmoid(gates[0:H]); f = _sigmoid(gates[H:2 * H])
            g = np.tanh(gates[2 * H:3 * H]); o = _sigmoid(gates[3 * H:4 * H])
            c = f * c + i * g
            h = o * np.tanh(c)
            out[bi, t, 0:H] = h
        h = np.zeros(H, np.float32); c = np.zeros(H, np.float32)
        for t in range(Lb - 1, -1, -1):
            gates = wih_b @ x[bi, t] + bih_b + whh_b @ h + bhh_b
            i = _sigmoid(gates[0:H]); f = _sigmoid(gates[H:2 * H])
            g = np.tanh(gates[2 * H:3 * H]); o = _sigmoid(gates[3 * H:4 * H])
            c = f * c + i * g
            h = o * np.tanh(c)
            out[bi, t, H:2 * H] = h
    return out


# ----------------------------------------------------------------------------
if __name__ == "__main__":
    # Hyperparameters (args.*) — small synthetic configuration.
    B, L = 2, 16
    n_features = 32
    n_filters = 16
    conv_kernels = (1, 3, 5)
    n_hid = 64            # 2*n_hid = 128 -> lane-dense LSTM output

    key = jax.random.PRNGKey(0)
    ks = list(jax.random.split(key, 32))
    kit = iter(ks)

    def nrm(shape, scale=0.1):
        return jax.random.normal(next(kit), shape, jnp.float32) * scale

    def q(a):   # snap MXU-bound weights to the bf16 grid so kernel & f32 ref agree
        return a.astype(jnp.bfloat16).astype(jnp.float32)

    # Parameters (deterministic, shapes follow the PyTorch __init__).
    embed = q(nrm((21, n_features)))
    embed = embed.at[20].set(0.0)                            # padding_idx = 20
    convs = [(q(nrm((n_filters, n_features, k))), nrm((n_filters,)))
             for k in conv_kernels]
    cnn_final_w = q(nrm((128, len(conv_kernels) * n_filters, 3)))
    cnn_final_b = nrm((128,))
    lstm = (
        q(nrm((4 * n_hid, 128))), q(nrm((4 * n_hid, n_hid))), nrm((4 * n_hid,)), nrm((4 * n_hid,)),  # fwd
        q(nrm((4 * n_hid, 128))), q(nrm((4 * n_hid, n_hid))), nrm((4 * n_hid,)), nrm((4 * n_hid,)),  # rev
    )
    params = {"embed": embed, "convs": convs,
              "cnn_final_w": cnn_final_w, "cnn_final_b": cnn_final_b, "lstm": lstm}

    # Inputs: token ids in [0, 20), padded positions set to padding idx 20.
    seq_lengths = jnp.array([16, 12], dtype=jnp.int32)       # sorted descending (pack_padded requirement)
    inp = jax.random.randint(next(kit), (B, L), 0, 20, dtype=jnp.int32)
    pos = jnp.arange(L)[None, :]
    inp = jnp.where(pos < seq_lengths[:, None], inp, 20)

    kp = prepare_params(params)
    out = encoder_forward(inp, seq_lengths, kp)
    out = jax.block_until_ready(out)
    assert out.shape == (B, L, 2 * n_hid)

    ref = ref_forward(inp, np.asarray(seq_lengths), params, n_hid)
    np.testing.assert_allclose(np.asarray(out), ref, atol=5e-3, rtol=5e-2)

    print("KERNEL_OK")
</pallas_src>

<mosaic_0001>
module attributes {stable_mosaic.version = 11 : i64} {
  func.func @kernel(%arg0: i32, %arg1: memref<1x20x32xf32, #tpu.memory_space<vmem>>, %arg2: memref<1x32x16xbf16, #tpu.memory_space<vmem>>, %arg3: memref<1x16xf32, #tpu.memory_space<vmem>>, %arg4: memref<3x32x16xbf16, #tpu.memory_space<vmem>>, %arg5: memref<1x16xf32, #tpu.memory_space<vmem>>, %arg6: memref<5x32x16xbf16, #tpu.memory_space<vmem>>, %arg7: memref<1x16xf32, #tpu.memory_space<vmem>>, %arg8: memref<3x48x128xbf16, #tpu.memory_space<vmem>>, %arg9: memref<1x128xf32, #tpu.memory_space<vmem>>, %arg10: memref<128x512xbf16, #tpu.memory_space<vmem>>, %arg11: memref<1x512xf32, #tpu.memory_space<vmem>>, %arg12: memref<1x16x512xf32, #tpu.memory_space<vmem>>, %arg13: memref<18x48xf32, #tpu.memory_space<vmem>>) attributes {dimension_semantics = [#tpu.dimension_semantics<parallel>], iteration_bounds = array<i64: 2>, scalar_prefetch = 0 : i64, scratch_operands = 1 : i64, tpu.core_type = #tpu.core_type<tc>, window_params = [{transform_indices = @transform_0, window_bounds = array<i64: 1, 20, 32>}, {pipeline_mode = #tpu.pipeline_mode<synchronous>, transform_indices = @transform_1, window_bounds = array<i64: 1, 32, 16>}, {pipeline_mode = #tpu.pipeline_mode<synchronous>, transform_indices = @transform_2, window_bounds = array<i64: 1, 16>}, {pipeline_mode = #tpu.pipeline_mode<synchronous>, transform_indices = @transform_3, window_bounds = array<i64: 3, 32, 16>}, {pipeline_mode = #tpu.pipeline_mode<synchronous>, transform_indices = @transform_4, window_bounds = array<i64: 1, 16>}, {pipeline_mode = #tpu.pipeline_mode<synchronous>, transform_indices = @transform_5, window_bounds = array<i64: 5, 32, 16>}, {pipeline_mode = #tpu.pipeline_mode<synchronous>, transform_indices = @transform_6, window_bounds = array<i64: 1, 16>}, {pipeline_mode = #tpu.pipeline_mode<synchronous>, transform_indices = @transform_7, window_bounds = array<i64: 3, 48, 128>}, {pipeline_mode = #tpu.pipeline_mode<synchronous>, transform_indices = @transform_8, window_bounds = array<i64: 1, 128>}, {pipeline_mode = #tpu.pipeline_mode<synchronous>, transform_indices = @transform_9, window_bounds = array<i64: 128, 512>}, {pipeline_mode = #tpu.pipeline_mode<synchronous>, transform_indices = @transform_10, window_bounds = array<i64: 1, 512>}, {transform_indices = @transform_11, window_bounds = array<i64: 1, 16, 512>}]} {
    %cst = arith.constant 0.000000e+00 : f32
    %0 = vector.broadcast %cst : f32 to vector<16x16xf32>
    %c0 = arith.constant 0 : index
    %c2 = arith.constant 2 : index
    %c0_0 = arith.constant 0 : index
    %1 = vector.load %arg1[%c0, %c2, %c0_0] : memref<1x20x32xf32, #tpu.memory_space<vmem>>, vector<1x16x32xf32>
    %2 = vector.shape_cast %1 : vector<1x16x32xf32> to vector<16x32xf32>
    %3 = arith.truncf %2 : vector<16x32xf32> to vector<16x32xbf16>
    %c0_1 = arith.constant 0 : index
    %c0_2 = arith.constant 0 : index
    %c0_3 = arith.constant 0 : index
    %4 = vector.load %arg2[%c0_1, %c0_2, %c0_3] : memref<1x32x16xbf16, #tpu.memory_space<vmem>>, vector<1x32x16xbf16>
    %5 = vector.shape_cast %4 : vector<1x32x16xbf16> to vector<32x16xbf16>
    %cst_4 = arith.constant dense<0.000000e+00> : vector<16x16xf32>
    %6 = tpu.matmul %3, %5, %cst_4 {dimension_numbers = #tpu.dot_dimension_numbers<[1], [0], [0], [1], [0, 0, 1, 1], [], []>} : vector<16x32xbf16>, vector<32x16xbf16>, vector<16x16xf32> -> vector<16x16xf32>
    %7 = arith.addf %0, %6 : vector<16x16xf32>
    %c0_5 = arith.constant 0 : index
    %c0_6 = arith.constant 0 : index
    %8 = vector.load %arg3[%c0_5, %c0_6] : memref<1x16xf32, #tpu.memory_space<vmem>>, vector<1x16xf32>
    %9 = vector.broadcast %8 : vector<1x16xf32> to vector<16x16xf32>
    %10 = arith.addf %7, %9 : vector<16x16xf32>
    %cst_7 = arith.constant 0.000000e+00 : f32
    %11 = vector.broadcast %cst_7 : f32 to vector<16x16xf32>
    %12 = arith.maximumf %10, %11 : vector<16x16xf32>
    %cst_8 = arith.constant 0.000000e+00 : f32
    %13 = vector.broadcast %cst_8 : f32 to vector<16x16xf32>
    %c0_9 = arith.constant 0 : index
    %c1 = arith.constant 1 : index
    %c0_10 = arith.constant 0 : index
    %14 = vector.load %arg1[%c0_9, %c1, %c0_10] : memref<1x20x32xf32, #tpu.memory_space<vmem>>, vector<1x16x32xf32>
    %15 = vector.shape_cast %14 : vector<1x16x32xf32> to vector<16x32xf32>
    %16 = arith.truncf %15 : vector<16x32xf32> to vector<16x32xbf16>
    %c0_11 = arith.constant 0 : index
    %c0_12 = arith.constant 0 : index
    %c0_13 = arith.constant 0 : index
    %17 = vector.load %arg4[%c0_11, %c0_12, %c0_13] : memref<3x32x16xbf16, #tpu.memory_space<vmem>>, vector<1x32x16xbf16>
    %18 = vector.shape_cast %17 : vector<1x32x16xbf16> to vector<32x16xbf16>
    %cst_14 = arith.constant dense<0.000000e+00> : vector<16x16xf32>
    %19 = tpu.matmul %16, %18, %cst_14 {dimension_numbers = #tpu.dot_dimension_numbers<[1], [0], [0], [1], [0, 0, 1, 1], [], []>} : vector<16x32xbf16>, vector<32x16xbf16>, vector<16x16xf32> -> vector<16x16xf32>
    %20 = arith.addf %13, %19 : vector<16x16xf32>
    %c0_15 = arith.constant 0 : index
    %c2_16 = arith.constant 2 : index
    %c0_17 = arith.constant 0 : index
    %21 = vector.load %arg1[%c0_15, %c2_16, %c0_17] : memref<1x20x32xf32, #tpu.memory_space<vmem>>, vector<1x16x32xf32>
    %22 = vector.shape_cast %21 : vector<1x16x32xf32> to vector<16x32xf32>
    %23 = arith.truncf %22 : vector<16x32xf32> to vector<16x32xbf16>
    %c1_18 = arith.constant 1 : index
    %c0_19 = arith.constant 0 : index
    %c0_20 = arith.constant 0 : index
    %24 = vector.load %arg4[%c1_18, %c0_19, %c0_20] : memref<3x32x16xbf16, #tpu.memory_space<vmem>>, vector<1x32x16xbf16>
    %25 = vector.shape_cast %24 : vector<1x32x16xbf16> to vector<32x16xbf16>
    %cst_21 = arith.constant dense<0.000000e+00> : vector<16x16xf32>
    %26 = tpu.matmul %23, %25, %cst_21 {dimension_numbers = #tpu.dot_dimension_numbers<[1], [0], [0], [1], [0, 0, 1, 1], [], []>} : vector<16x32xbf16>, vector<32x16xbf16>, vector<16x16xf32> -> vector<16x16xf32>
    %27 = arith.addf %20, %26 : vector<16x16xf32>
    %c0_22 = arith.constant 0 : index
    %c3 = arith.constant 3 : index
    %c0_23 = arith.constant 0 : index
    %28 = vector.load %arg1[%c0_22, %c3, %c0_23] : memref<1x20x32xf32, #tpu.memory_space<vmem>>, vector<1x16x32xf32>
    %29 = vector.shape_cast %28 : vector<1x16x32xf32> to vector<16x32xf32>
    %30 = arith.truncf %29 : vector<16x32xf32> to vector<16x32xbf16>
    %c2_24 = arith.constant 2 : index
    %c0_25 = arith.constant 0 : index
    %c0_26 = arith.constant 0 : index
    %31 = vector.load %arg4[%c2_24, %c0_25, %c0_26] : memref<3x32x16xbf16, #tpu.memory_space<vmem>>, vector<1x32x16xbf16>
    %32 = vector.shape_cast %31 : vector<1x32x16xbf16> to vector<32x16xbf16>
    %cst_27 = arith.constant dense<0.000000e+00> : vector<16x16xf32>
    %33 = tpu.matmul %30, %32, %cst_27 {dimension_numbers = #tpu.dot_dimension_numbers<[1], [0], [0], [1], [0, 0, 1, 1], [], []>} : vector<16x32xbf16>, vector<32x16xbf16>, vector<16x16xf32> -> vector<16x16xf32>
    %34 = arith.addf %27, %33 : vector<16x16xf32>
    %c0_28 = arith.constant 0 : index
    %c0_29 = arith.constant 0 : index
    %35 = vector.load %arg5[%c0_28, %c0_29] : memref<1x16xf32, #tpu.memory_space<vmem>>, vector<1x16xf32>
    %36 = vector.broadcast %35 : vector<1x16xf32> to vector<16x16xf32>
    %37 = arith.addf %34, %36 : vector<16x16xf32>
    %cst_30 = arith.constant 0.000000e+00 : f32
    %38 = vector.broadcast %cst_30 : f32 to vector<16x16xf32>
    %39 = arith.maximumf %37, %38 : vector<16x16xf32>
    %cst_31 = arith.constant 0.000000e+00 : f32
    %40 = vector.broadcast %cst_31 : f32 to vector<16x16xf32>
    %c0_32 = arith.constant 0 : index
    %c0_33 = arith.constant 0 : index
    %c0_34 = arith.constant 0 : index
    %41 = vector.load %arg1[%c0_32, %c0_33, %c0_34] : memref<1x20x32xf32, #tpu.memory_space<vmem>>, vector<1x16x32xf32>
    %42 = vector.shape_cast %41 : vector<1x16x32xf32> to vector<16x32xf32>
    %43 = arith.truncf %42 : vector<16x32xf32> to vector<16x32xbf16>
    %c0_35 = arith.constant 0 : index
    %c0_36 = arith.constant 0 : index
    %c0_37 = arith.constant 0 : index
    %44 = vector.load %arg6[%c0_35, %c0_36, %c0_37] : memref<5x32x16xbf16, #tpu.memory_space<vmem>>, vector<1x32x16xbf16>
    %45 = vector.shape_cast %44 : vector<1x32x16xbf16> to vector<32x16xbf16>
    %cst_38 = arith.constant dense<0.000000e+00> : vector<16x16xf32>
    %46 = tpu.matmul %43, %45, %cst_38 {dimension_numbers = #tpu.dot_dimension_numbers<[1], [0], [0], [1], [0, 0, 1, 1], [], []>} : vector<16x32xbf16>, vector<32x16xbf16>, vector<16x16xf32> -> vector<16x16xf32>
    %47 = arith.addf %40, %46 : vector<16x16xf32>
    %c0_39 = arith.constant 0 : index
    %c1_40 = arith.constant 1 : index
    %c0_41 = arith.constant 0 : index
    %48 = vector.load %arg1[%c0_39, %c1_40, %c0_41] : memref<1x20x32xf32, #tpu.memory_space<vmem>>, vector<1x16x32xf32>
    %49 = vector.shape_cast %48 : vector<1x16x32xf32> to vector<16x32xf32>
    %50 = arith.truncf %49 : vector<16x32xf32> to vector<16x32xbf16>
    %c1_42 = arith.constant 1 : index
    %c0_43 = arith.constant 0 : index
    %c0_44 = arith.constant 0 : index
    %51 = vector.load %arg6[%c1_42, %c0_43, %c0_44] : memref<5x32x16xbf16, #tpu.memory_space<vmem>>, vector<1x32x16xbf16>
    %52 = vector.shape_cast %51 : vector<1x32x16xbf16> to vector<32x16xbf16>
    %cst_45 = arith.constant dense<0.000000e+00> : vector<16x16xf32>
    %53 = tpu.matmul %50, %52, %cst_45 {dimension_numbers = #tpu.dot_dimension_numbers<[1], [0], [0], [1], [0, 0, 1, 1], [], []>} : vector<16x32xbf16>, vector<32x16xbf16>, vector<16x16xf32> -> vector<16x16xf32>
    %54 = arith.addf %47, %53 : vector<16x16xf32>
    %c0_46 = arith.constant 0 : index
    %c2_47 = arith.constant 2 : index
    %c0_48 = arith.constant 0 : index
    %55 = vector.load %arg1[%c0_46, %c2_47, %c0_48] : memref<1x20x32xf32, #tpu.memory_space<vmem>>, vector<1x16x32xf32>
    %56 = vector.shape_cast %55 : vector<1x16x32xf32> to vector<16x32xf32>
    %57 = arith.truncf %56 : vector<16x32xf32> to vector<16x32xbf16>
    %c2_49 = arith.constant 2 : index
    %c0_50 = arith.constant 0 : index
    %c0_51 = arith.constant 0 : index
    %58 = vector.load %arg6[%c2_49, %c0_50, %c0_51] : memref<5x32x16xbf16, #tpu.memory_space<vmem>>, vector<1x32x16xbf16>
    %59 = vector.shape_cast %58 : vector<1x32x16xbf16> to vector<32x16xbf16>
    %cst_52 = arith.constant dense<0.000000e+00> : vector<16x16xf32>
    %60 = tpu.matmul %57, %59, %cst_52 {dimension_numbers = #tpu.dot_dimension_numbers<[1], [0], [0], [1], [0, 0, 1, 1], [], []>} : vector<16x32xbf16>, vector<32x16xbf16>, vector<16x16xf32> -> vector<16x16xf32>
    %61 = arith.addf %54, %60 : vector<16x16xf32>
    %c0_53 = arith.constant 0 : index
    %c3_54 = arith.constant 3 : index
    %c0_55 = arith.constant 0 : index
    %62 = vector.load %arg1[%c0_53, %c3_54, %c0_55] : memref<1x20x32xf32, #tpu.memory_space<vmem>>, vector<1x16x32xf32>
    %63 = vector.shape_cast %62 : vector<1x16x32xf32> to vector<16x32xf32>
    %64 = arith.truncf %63 : vector<16x32xf32> to vector<16x32xbf16>
    %c3_56 = arith.constant 3 : index
    %c0_57 = arith.constant 0 : index
    %c0_58 = arith.constant 0 : index
    %65 = vector.load %arg6[%c3_56, %c0_57, %c0_58] : memref<5x32x16xbf16, #tpu.memory_space<vmem>>, vector<1x32x16xbf16>
    %66 = vector.shape_cast %65 : vector<1x32x16xbf16> to vector<32x16xbf16>
    %cst_59 = arith.constant dense<0.000000e+00> : vector<16x16xf32>
    %67 = tpu.matmul %64, %66, %cst_59 {dimension_numbers = #tpu.dot_dimension_numbers<[1], [0], [0], [1], [0, 0, 1, 1], [], []>} : vector<16x32xbf16>, vector<32x16xbf16>, vector<16x16xf32> -> vector<16x16xf32>
    %68 = arith.addf %61, %67 : vector<16x16xf32>
    %c0_60 = arith.constant 0 : index
    %c4 = arith.constant 4 : index
    %c0_61 = arith.constant 0 : index
    %69 = vector.load %arg1[%c0_60, %c4, %c0_61] : memref<1x20x32xf32, #tpu.memory_space<vmem>>, vector<1x16x32xf32>
    %70 = vector.shape_cast %69 : vector<1x16x32xf32> to vector<16x32xf32>
    %71 = arith.truncf %70 : vector<16x32xf32> to vector<16x32xbf16>
    %c4_62 = arith.constant 4 : index
    %c0_63 = arith.constant 0 : index
    %c0_64 = arith.constant 0 : index
    %72 = vector.load %arg6[%c4_62, %c0_63, %c0_64] : memref<5x32x16xbf16, #tpu.memory_space<vmem>>, vector<1x32x16xbf16>
    %73 = vector.shape_cast %72 : vector<1x32x16xbf16> to vector<32x16xbf16>
    %cst_65 = arith.constant dense<0.000000e+00> : vector<16x16xf32>
    %74 = tpu.matmul %71, %73, %cst_65 {dimension_numbers = #tpu.dot_dimension_numbers<[1], [0], [0], [1], [0, 0, 1, 1], [], []>} : vector<16x32xbf16>, vector<32x16xbf16>, vector<16x16xf32> -> vector<16x16xf32>
    %75 = arith.addf %68, %74 : vector<16x16xf32>
    %c0_66 = arith.constant 0 : index
    %c0_67 = arith.constant 0 : index
    %76 = vector.load %arg7[%c0_66, %c0_67] : memref<1x16xf32, #tpu.memory_space<vmem>>, vector<1x16xf32>
    %77 = vector.broadcast %76 : vector<1x16xf32> to vector<16x16xf32>
    %78 = arith.addf %75, %77 : vector<16x16xf32>
    %cst_68 = arith.constant 0.000000e+00 : f32
    %79 = vector.broadcast %cst_68 : f32 to vector<16x16xf32>
    %80 = arith.maximumf %78, %79 : vector<16x16xf32>
    %81 = tpu.concatenate %12, %39, %80 in 1 : vector<16x16xf32>, vector<16x16xf32>, vector<16x16xf32> -> vector<16x48xf32>
    %cst_69 = arith.constant 0.000000e+00 : f32
    %82 = vector.broadcast %cst_69 : f32 to vector<18x48xf32>
    %c0_70 = arith.constant 0 : index
    %c0_71 = arith.constant 0 : index
    %83 = vector.load %arg13[%c0_70, %c0_71] : memref<18x48xf32, #tpu.memory_space<vmem>>, vector<18x48xf32>
    tpu.vector_store %arg13[%c0_70, %c0_71], %82 {strides = array<i32>} : memref<18x48xf32, #tpu.memory_space<vmem>>, vector<18x48xf32>,
    %c1_72 = arith.constant 1 : index
    %c0_73 = arith.constant 0 : index
    %84 = vector.load %arg13[%c1_72, %c0_73] : memref<18x48xf32, #tpu.memory_space<vmem>>, vector<16x48xf32>
    tpu.vector_store %arg13[%c1_72, %c0_73], %81 {strides = array<i32>} : memref<18x48xf32, #tpu.memory_space<vmem>>, vector<16x48xf32>,
    %cst_74 = arith.constant 0.000000e+00 : f32
    %85 = vector.broadcast %cst_74 : f32 to vector<16x128xf32>
    %c0_75 = arith.constant 0 : index
    %c0_76 = arith.constant 0 : index
    %86 = vector.load %arg13[%c0_75, %c0_76] : memref<18x48xf32, #tpu.memory_space<vmem>>, vector<16x48xf32>
    %87 = arith.truncf %86 : vector<16x48xf32> to vector<16x48xbf16>
    %c0_77 = arith.constant 0 : index
    %c0_78 = arith.constant 0 : index
    %c0_79 = arith.constant 0 : index
    %88 = vector.load %arg8[%c0_77, %c0_78, %c0_79] : memref<3x48x128xbf16, #tpu.memory_space<vmem>>, vector<1x48x128xbf16>
    %89 = vector.shape_cast %88 : vector<1x48x128xbf16> to vector<48x128xbf16>
    %cst_80 = arith.constant dense<0.000000e+00> : vector<16x128xf32>
    %90 = tpu.matmul %87, %89, %cst_80 {dimension_numbers = #tpu.dot_dimension_numbers<[1], [0], [0], [1], [0, 0, 1, 1], [], []>} : vector<16x48xbf16>, vector<48x128xbf16>, vector<16x128xf32> -> vector<16x128xf32>
    %91 = arith.addf %85, %90 : vector<16x128xf32>
    %c1_81 = arith.constant 1 : index
    %c0_82 = arith.constant 0 : index
    %92 = vector.load %arg13[%c1_81, %c0_82] : memref<18x48xf32, #tpu.memory_space<vmem>>, vector<16x48xf32>
    %93 = arith.truncf %92 : vector<16x48xf32> to vector<16x48xbf16>
    %c1_83 = arith.constant 1 : index
    %c0_84 = arith.constant 0 : index
    %c0_85 = arith.constant 0 : index
    %94 = vector.load %arg8[%c1_83, %c0_84, %c0_85] : memref<3x48x128xbf16, #tpu.memory_space<vmem>>, vector<1x48x128xbf16>
    %95 = vector.shape_cast %94 : vector<1x48x128xbf16> to vector<48x128xbf16>
    %cst_86 = arith.constant dense<0.000000e+00> : vector<16x128xf32>
    %96 = tpu.matmul %93, %95, %cst_86 {dimension_numbers = #tpu.dot_dimension_numbers<[1], [0], [0], [1], [0, 0, 1, 1], [], []>} : vector<16x48xbf16>, vector<48x128xbf16>, vector<16x128xf32> -> vector<16x128xf32>
    %97 = arith.addf %91, %96 : vector<16x128xf32>
    %c2_87 = arith.constant 2 : index
    %c0_88 = arith.constant 0 : index
    %98 = vector.load %arg13[%c2_87, %c0_88] : memref<18x48xf32, #tpu.memory_space<vmem>>, vector<16x48xf32>
    %99 = arith.truncf %98 : vector<16x48xf32> to vector<16x48xbf16>
    %c2_89 = arith.constant 2 : index
    %c0_90 = arith.constant 0 : index
    %c0_91 = arith.constant 0 : index
    %100 = vector.load %arg8[%c2_89, %c0_90, %c0_91] : memref<3x48x128xbf16, #tpu.memory_space<vmem>>, vector<1x48x128xbf16>
    %101 = vector.shape_cast %100 : vector<1x48x128xbf16> to vector<48x128xbf16>
    %cst_92 = arith.constant dense<0.000000e+00> : vector<16x128xf32>
    %102 = tpu.matmul %99, %101, %cst_92 {dimension_numbers = #tpu.dot_dimension_numbers<[1], [0], [0], [1], [0, 0, 1, 1], [], []>} : vector<16x48xbf16>, vector<48x128xbf16>, vector<16x128xf32> -> vector<16x128xf32>
    %103 = arith.addf %97, %102 : vector<16x128xf32>
    %c0_93 = arith.constant 0 : index
    %c0_94 = arith.constant 0 : index
    %104 = vector.load %arg9[%c0_93, %c0_94] : memref<1x128xf32, #tpu.memory_space<vmem>>, vector<1x128xf32>
    %105 = vector.broadcast %104 : vector<1x128xf32> to vector<16x128xf32>
    %106 = arith.addf %103, %105 : vector<16x128xf32>
    %cst_95 = arith.constant 0.000000e+00 : f32
    %107 = vector.broadcast %cst_95 : f32 to vector<16x128xf32>
    %108 = arith.maximumf %106, %107 : vector<16x128xf32>
    %109 = arith.truncf %108 : vector<16x128xf32> to vector<16x128xbf16>
    %c0_96 = arith.constant 0 : index
    %c0_97 = arith.constant 0 : index
    %110 = vector.load %arg10[%c0_96, %c0_97] : memref<128x512xbf16, #tpu.memory_space<vmem>>, vector<128x512xbf16>
    %cst_98 = arith.constant dense<0.000000e+00> : vector<16x512xf32>
    %111 = tpu.matmul %109, %110, %cst_98 {dimension_numbers = #tpu.dot_dimension_numbers<[1], [0], [0], [1], [0, 0, 1, 1], [], []>} : vector<16x128xbf16>, vector<128x512xbf16>, vector<16x512xf32> -> vector<16x512xf32>
    %c0_99 = arith.constant 0 : index
    %c0_100 = arith.constant 0 : index
    %112 = vector.load %arg11[%c0_99, %c0_100] : memref<1x512xf32, #tpu.memory_space<vmem>>, vector<1x512xf32>
    %113 = vector.broadcast %112 : vector<1x512xf32> to vector<16x512xf32>
    %114 = arith.addf %111, %113 : vector<16x512xf32>
    %c0_101 = arith.constant 0 : index
    %c0_102 = arith.constant 0 : index
    %c0_103 = arith.constant 0 : index
    %115 = vector.load %arg12[%c0_101, %c0_102, %c0_103] : memref<1x16x512xf32, #tpu.memory_space<vmem>>, vector<1x16x512xf32>
    %116 = vector.shape_cast %115 : vector<1x16x512xf32> to vector<16x512xf32>
    %117 = vector.shape_cast %114 : vector<16x512xf32> to vector<1x16x512xf32>
    tpu.vector_store %arg12[%c0_101, %c0_102, %c0_103], %117 {strides = array<i32>} : memref<1x16x512xf32, #tpu.memory_space<vmem>>, vector<1x16x512xf32>,
    return
  }
  func.func @transform_0(%arg0: i32) -> (i32, i32, i32) {
    %c0_i32 = arith.constant 0 : i32
    %c0_i32_0 = arith.constant 0 : i32
    %c0_i32_1 = arith.constant 0 : i32
    return %arg0, %c0_i32, %c0_i32_0 : i32, i32, i32
  }
  func.func @transform_1(%arg0: i32) -> (i32, i32, i32) {
    %c0_i32 = arith.constant 0 : i32
    %c0_i32_0 = arith.constant 0 : i32
    %c0_i32_1 = arith.constant 0 : i32
    %c0_i32_2 = arith.constant 0 : i32
    return %c0_i32, %c0_i32_0, %c0_i32_1 : i32, i32, i32
  }
  func.func @transform_2(%arg0: i32) -> (i32, i32) {
    %c0_i32 = arith.constant 0 : i32
    %c0_i32_0 = arith.constant 0 : i32
    %c0_i32_1 = arith.constant 0 : i32
    return %c0_i32, %c0_i32_0 : i32, i32
  }
  func.func @transform_3(%arg0: i32) -> (i32, i32, i32) {
    %c0_i32 = arith.constant 0 : i32
    %c0_i32_0 = arith.constant 0 : i32
    %c0_i32_1 = arith.constant 0 : i32
    %c0_i32_2 = arith.constant 0 : i32
    return %c0_i32, %c0_i32_0, %c0_i32_1 : i32, i32, i32
  }
  func.func @transform_4(%arg0: i32) -> (i32, i32) {
    %c0_i32 = arith.constant 0 : i32
    %c0_i32_0 = arith.constant 0 : i32
    %c0_i32_1 = arith.constant 0 : i32
    return %c0_i32, %c0_i32_0 : i32, i32
  }
  func.func @transform_5(%arg0: i32) -> (i32, i32, i32) {
    %c0_i32 = arith.constant 0 : i32
    %c0_i32_0 = arith.constant 0 : i32
    %c0_i32_1 = arith.constant 0 : i32
    %c0_i32_2 = arith.constant 0 : i32
    return %c0_i32, %c0_i32_0, %c0_i32_1 : i32, i32, i32
  }
  func.func @transform_6(%arg0: i32) -> (i32, i32) {
    %c0_i32 = arith.constant 0 : i32
    %c0_i32_0 = arith.constant 0 : i32
    %c0_i32_1 = arith.constant 0 : i32
    return %c0_i32, %c0_i32_0 : i32, i32
  }
  func.func @transform_7(%arg0: i32) -> (i32, i32, i32) {
    %c0_i32 = arith.constant 0 : i32
    %c0_i32_0 = arith.constant 0 : i32
    %c0_i32_1 = arith.constant 0 : i32
    %c0_i32_2 = arith.constant 0 : i32
    return %c0_i32, %c0_i32_0, %c0_i32_1 : i32, i32, i32
  }
  func.func @transform_8(%arg0: i32) -> (i32, i32) {
    %c0_i32 = arith.constant 0 : i32
    %c0_i32_0 = arith.constant 0 : i32
    %c0_i32_1 = arith.constant 0 : i32
    return %c0_i32, %c0_i32_0 : i32, i32
  }
  func.func @transform_9(%arg0: i32) -> (i32, i32) {
    %c0_i32 = arith.constant 0 : i32
    %c0_i32_0 = arith.constant 0 : i32
    %c0_i32_1 = arith.constant 0 : i32
    return %c0_i32, %c0_i32_0 : i32, i32
  }
  func.func @transform_10(%arg0: i32) -> (i32, i32) {
    %c0_i32 = arith.constant 0 : i32
    %c0_i32_0 = arith.constant 0 : i32
    %c0_i32_1 = arith.constant 0 : i32
    return %c0_i32, %c0_i32_0 : i32, i32
  }
  func.func @transform_11(%arg0: i32) -> (i32, i32, i32) {
    %c0_i32 = arith.constant 0 : i32
    %c0_i32_0 = arith.constant 0 : i32
    %c0_i32_1 = arith.constant 0 : i32
    return %arg0, %c0_i32, %c0_i32_0 : i32, i32, i32
  }
}

</mosaic_0001>

<bundles_post_ra>
// kernel: tpu_custom_call.1
= control target key start
LH: loop header
LB: loop body
LE: loop exit
PB: predicated region body
PF: predicated region fallthrough
CT: control target
= control target key end

     0   :  { %s2086_s0 = inlined_call_operand.vmem [shape: f32[2,20,32], index: 0, kind: input, shape index: {}]   ;;  %s2087_s1 = inlined_call_operand.vmem [shape: bf16[1,32,16], index: 1, kind: input, shape index: {}]   ;;  %s2088_s2 = inlined_call_operand.vmem [shape: f32[1,16], index: 2, kind: input, shape index: {}]   ;;  %s2089_s3 = inlined_call_operand.vmem [shape: bf16[3,32,16], index: 3, kind: input, shape index: {}]   ;;  %s2090_s4 = inlined_call_operand.vmem [shape: f32[1,16], index: 4, kind: input, shape index: {}]   ;;  %s2091_s5 = inlined_call_operand.vmem [shape: bf16[5,32,16], index: 5, kind: input, shape index: {}]   ;;  %s2092_s6 = inlined_call_operand.vmem [shape: f32[1,16], index: 6, kind: input, shape index: {}]   ;;  %s2093_s7 = inlined_call_operand.vmem [shape: bf16[3,48,128], index: 7, kind: input, shape index: {}]   ;;  %s2094_s8 = inlined_call_operand.vmem [shape: f32[1,128], index: 8, kind: input, shape index: {}]   ;;  %s2095_s9 = inlined_call_operand.hbm [shape: bf16[128,512], index: 9, kind: input, shape index: {}]   ;;  %s2096_s10 = inlined_call_operand.vmem [shape: f32[1,512], index: 10, kind: input, shape index: {}]   ;;  %s2097_s11 = inlined_call_operand.hbm [shape: f32[2,16,512], index: 11, kind: output, shape index: {}]  }
   0x1   :  { %2099 = sst [smem:[#allocation9_spill]] %s2095_s9 }
   0x2   :  { %16 = vsyncpa [#allocation4], 0 }
   0x3   :  { %17 = vsyncpa [#allocation5], 0 }
   0x4   :  { %19 = vsyncpa [#allocation5 + $0x1], 0  ;;  %s1852_s17 = smov 0   ;;  %s1854_s18 = smov 0  }
   0x5   :  { %s1856_s19 = smov 0   ;;  %s1858_s20 = smov 0  }
   0x6 LB: > { %s1873_s21 = sadd.s32 4294967295, %s1783_s20   ;;  %s1269_s22 = sadd.s32 4294967294, %s1783_s20   ;;  %s1783_s20 = sphi %s1858_s20, %s2107_s20   ;;  %s1779_s19 = sphi %s1856_s19, %s2106_s19   ;;  %s1775_s18 = sphi %s1854_s18, %s2105_s18   ;;  %s1771_s17 = sphi %s1852_s17, %s2104_s17  }
   0x7   : > { %s1877_s23 = sadd.s32 1, %s1783_s20   ;;  %s268_s24 = sadd.s32 1, %s1779_s19 }
   0x8   : > { %s265_s25 = ssub.s32 %s1783_s20, %s1877_s23  ;;  %p278_p0 = scmp.ne.s32.totalorder %s1779_s19, %s1775_s18 }
   0x9   : > { %p266_p1 = scmp.eq.s32.totalorder %s265_s25, 0  ;;  %p279_p2 = scmp.eq.s32.totalorder %s1873_s21, 1 }
   0xa   : > { %p284_p3 = scmp.ne.s32.totalorder %s1775_s18, %s1771_s17  ;;  %p285_p4 = scmp.eq.s32.totalorder %s1269_s22, 1 }
   0xb   : > { %s1888_s26 = scalar_select %p266_p1, %s1779_s19, %s268_s24  }
   0xc   : > { %p1890_p5 = por %p279_p2, %p278_p0  ;;  %p1894_p6 = por %p285_p4, %p284_p3 }
   0xd   : > { %p1270_p7 = scmp.ge.s32.totalorder %s1783_s20, 1  ;;  %p292_p8 = scmp.lt.s32.totalorder %s1783_s20, 3 }
   0xe   : > { %p1641_p9 = scmp.eq.s32.totalorder %s1873_s21, 0  ;;  %s2102_s9 = sld [smem:[#allocation9_spill]] }
   0xf   : > { %p293_p10 = pnand %p1270_p7, %p292_p8  ;;  %s1785_s13 = smov [#allocation3]  }
  0x10   : > { %s329_s14 = sshll.u32 %s1785_s13, 4  ;;  %s1786_s15 = smov 256   ;;  %s330_s14 = int_to_ptr.vmem [resolvable:$true] %s329_s14 }
  0x11   : > { %p1633_p11 = pneg %p293_p10  ;;  %s1787_s16 = smov 16  }
  0x12   : > { %356 = sbr.rel (%p293_p10) target bundleno = 631 (0x277), region = 64 }
  0x13   : > { %p1634_p12 = pnand %p1641_p9, %p1633_p11 }
  0x14   : > { %s327_s12 = sshll.u32 %s2102_s9, 4  ;;  %s328_s12 = int_to_ptr.hbm [resolvable:$true] %s327_s12 }
  0x15   : > { %1636 = dma.hbm_to_vmem [thread:$0]  (!%p1634_p12), %s328_s12, 4096, %s330_s14, [#allocation4], %s1786_s15, %s1786_s15, %s1787_s16  }
  0x17   : > { %1762 = dma.done.wait (%p1641_p9), [#allocation4], 4096  }
  0x18   : > { %1764 = vsyncadd (%p1641_p9), [#allocation4], 4294963200  ;;  %p397_p13 = scmp.lt.s32.totalorder %s1873_s21, 1  ;;  %v1567_v0 = vld [vmem:[%s2087_s1 + $0x8] sm:$0xff]  ;;  %v1571_v1 = vld [vmem:[%s2089_s3 + $0x18] sm:$0xff]  ;;  %vm426_vm0 = vcmask 261120  }
  0x19   : > { %v1569_v2 = vld [vmem:[%s2089_s3 + $0x8] sm:$0xff]  ;;  %v1566_v4 = vld [vmem:[%s2087_s1] sm:$0xff]  ;;  %v1570_v5 = vld [vmem:[%s2089_s3 + $0x10] sm:$0xff]  ;;  %436 = vmatpush.bf16.msra.mxu0 %v1567_v0  ;;  %476 = vmatpush.bf16.msra.mxu1 %v1571_v1  ;;  %s2098_s29 = smov 32   ;;  %vm761_vm1 = vcmask 392192   ;;  %vm764_vm2 = vcmask 386048  }
  0x1a   : > { %s398_s22 = scalar_select %p397_p13, %s1873_s21, 1  ;;  %v1573_v3 = vld [vmem:[%s2089_s3 + $0x28] sm:$0xff]  ;;  %v1568_v6 = vld [vmem:[%s2089_s3] sm:$0xff]  ;;  %505 = vmatpush.bf16.msra.mxu2 %v1569_v2  ;;  %v1577_v14 = vld [vmem:[%s2091_s5 + $0x18] sm:$0xff]  ;;  %vm756_vm3 = vcmask 130048  }
  0x1b   : > { %v1572_v7 = vld [vmem:[%s2089_s3 + $0x20] sm:$0xff]  ;;  %542 = vmatpush.bf16.msra.mxu3 %v1573_v3  ;;  %v1579_v16 = vld [vmem:[%s2091_s5 + $0x28] sm:$0xff]  ;;  %v1581_v19 = vld [vmem:[%s2091_s5 + $0x38] sm:$0xff]  ;;  %s394_s14 = sand.u32 1, %s1775_s18   ;;  %s1737_s25 = scalar_lea.hbm %s2097_s11, 128 }
  0x1c   : > { %s1626_s24 = smul.u32 24, %s398_s22  ;;  %v1575_v20 = vld [vmem:[%s2091_s5 + $0x8] sm:$0xff]  ;;  %v1576_v21 = vld [vmem:[%s2091_s5 + $0x10] sm:$0xff]  ;;  %v1578_v22 = vld [vmem:[%s2091_s5 + $0x20] sm:$0xff]  ;;  %s1275_s22 = sshll.u32 %s394_s14, 6 }
  0x1d   : > { %437 = vmatpush.bf16.msra.mxu0 %v1566_v4  ;;  %477 = vmatpush.bf16.msra.mxu1 %v1570_v5  ;;  %v1583_v23 = vld [vmem:[%s2091_s5 + $0x48] sm:$0xff]  ;;  %v1574_v24 = vld [vmem:[%s2091_s5] sm:$0xff]  ;;  %v1580_v25 = vld [vmem:[%s2091_s5 + $0x30] sm:$0xff] }
  0x1e   : > { %s1915_s30 = scalar_lea.vmem %s2086_s0, %s1626_s24  ;;  %506 = vmatpush.bf16.msra.mxu2 %v1568_v6  ;;  %v1582_v26 = vld [vmem:[%s2091_s5 + $0x40] sm:$0xff]  ;;  %s396_s24 = scalar_lea.vmem [#allocation6], %s1275_s22 }
  0x1f   : > { %v403_v8 = vld [vmem:[%s1915_s30 + $0x2] sm:$0xff]  ;;  %v404_v9 = vld [vmem:[%s1915_s30 + $0xa] sm:$0xff]  ;;  %543 = vmatpush.bf16.msra.mxu3 %v1572_v7  ;;  %v1684_v39 = vld [vmem:[%s2090_s4] ss:$0 sm:$0xff]  ;;  %s1192_s12 = sshll.u32 %s396_s24, 4  ;;  %s1193_s12 = int_to_ptr.vmem [resolvable:$true] %s1192_s12 }
  0x20   : > { %v446_v10 = vld [vmem:[%s1915_s30 + $0x1] sm:$0xff]  ;;  %v447_v11 = vld [vmem:[%s1915_s30 + $0x9] sm:$0xff]  ;;  %v405_v15 = vpack.c.bf16 %v404_v9, %v403_v8  ;;  %v1685_v59 = vld [vmem:[%s2092_s6] ss:$0 sm:$0xff]  ;;  %v1790_v9 = vmov 0.0  }
  0x21   : > { %v513_v12 = vld [vmem:[%s1915_s30 + $0x3] sm:$0xff]  ;;  %v514_v13 = vld [vmem:[%s1915_s30 + $0xb] sm:$0xff]  ;;  %v448_v17 = vpack.c.bf16 %v447_v11, %v446_v10  ;;  %590 = vmatpush.bf16.msrb.mxu0 %v1577_v14  ;;  %619 = vmatpush.bf16.msrb.mxu1 %v1575_v20  ;;  %762 = vst.msk [vmem:[#allocation2] sm:$0xff] %vm761_vm1, %v1790_v9  ;;  %v1591_v14 = vld [vmem:[%s2093_s7 + $0x38] sm:$0xff] }
  0x22   : > { %v515_v18 = vpack.c.bf16 %v514_v13, %v513_v12  ;;  %650 = vmatpush.bf16.msrb.mxu2 %v1579_v16  ;;  %1285 = vmatmul.msk.bf16.vlgmr.msra.gmra.mxu0 %vm426_vm0, %v405_v15  ;;  %v560_v27 = vld [vmem:[%s1915_s30] sm:$0xff]  ;;  %v561_v28 = vld [vmem:[%s1915_s30 + $0x8] sm:$0xff]  ;;  %763 = vst.msk [vmem:[#allocation2 + $0x8] sm:$0xff] %vm761_vm1, %v1790_v9  ;;  %v1586_v10 = vld [vmem:[%s2093_s7 + $0x10] sm:$0xff] }
  0x23   : > { %1298 = vmatmul.msk.bf16.vlgmr.msra.gmra.mxu1 %vm426_vm0, %v405_v15  ;;  %1307 = vmatmul.msk.bf16.vlgmr.msra.gmra.mxu2 %vm426_vm0, %v448_v17  ;;  %v562_v29 = vpack.c.bf16 %v561_v28, %v560_v27  ;;  %v693_v30 = vld [vmem:[%s1915_s30 + $0x4] sm:$0xff]  ;;  %v694_v31 = vld [vmem:[%s1915_s30 + $0xc] sm:$0xff]  ;;  %s1788_s30 = smov 16   ;;  %765 = vst.msk [vmem:[#allocation2 + $0x10] sm:$0x3] %vm764_vm2, %v1790_v9 }
  0x24   : > { %1320 = vmatmul.msk.bf16.vlgmr.msra.gmra.mxu3 %vm426_vm0, %v515_v18  ;;  %v695_v32 = vpack.c.bf16 %v694_v31, %v693_v30  ;;  %v1592_v11 = vld [vmem:[%s2093_s7 + $0x40] sm:$0xff]  ;;  %v1589_v12 = vld [vmem:[%s2093_s7 + $0x28] sm:$0xff]  ;;  %v1547_v20 = vld [vmem:[#allocation3 + $0xe0] sm:$0xf] }
  0x25   : > { %683 = vmatpush.bf16.msrb.mxu3 %v1581_v19  ;;  %591 = vmatpush.bf16.msrb.mxu0 %v1576_v21  ;;  %v1585_v13 = vld [vmem:[%s2093_s7 + $0x8] sm:$0xff]  ;;  %v1584_v16 = vld [vmem:[%s2093_s7] sm:$0xff]  ;;  %v1557_v30 = vld [vmem:[#allocation3 + $0xf8] sm:$0xf0] }
  0x26   : > { %651 = vmatpush.bf16.msrb.mxu2 %v1578_v22  ;;  %620 = vmatpush.bf16.msrb.mxu1 %v1574_v24  ;;  %v1683_v19 = vld [vmem:[%s2088_s2] ss:$0 sm:$0xff]  ;;  %v1623_v21 = vld [vmem:[#allocation3 + $0xec] sm:$0xf0]  ;;  %v1621_v22 = vld [vmem:[#allocation3 + $0xe4] sm:$0xf] }
  0x27   : > { %v1549_v24 = vld [vmem:[#allocation3 + $0xf0] sm:$0xf0]  ;;  %v1531_v31 = vld [vmem:[#allocation3 + $0xc0] sm:$0xf] }
  0x28   : > { %v1552_v27 = vor.u32 %v1621_v22, %v1549_v24  ;;  %v1610_v22 = vld [vmem:[#allocation3 + $0x8c] sm:$0xf] }
  0x29   : > { %722 = vmatpush.bf16.msra.mxu0 %v1583_v23  ;;  %684 = vmatpush.bf16.msrb.mxu3 %v1580_v25  ;;  %v1548_v23 = vor.u32 %v1623_v21, %v1547_v20  ;;  %v1555_v25 = vld [vmem:[#allocation3 + $0xe8] sm:$0xf] }
  0x2a   : > { %848 = vmatpush.bf16.msra.mxu2 %v1586_v10  ;;  %813 = vmatpush.bf16.msra.mxu1 %v1589_v12  ;;  %v1614_v10 = vld [vmem:[#allocation3 + $0xac] sm:$0xf] }
  0x2d   : > { %723 = vmatpush.bf16.msra.mxu0 %v1582_v26  ;;  %893 = vmatpush.bf16.msra.mxu3 %v1592_v11  ;;  %v1624_v26 = vld [vmem:[#allocation3 + $0xf4] sm:$0xf0]  ;;  %v1525_v11 = vld [vmem:[#allocation3 + $0xb8] sm:$0xf0] }
  0x2e   : > { %849 = vmatpush.bf16.msra.mxu2 %v1585_v13  ;;  %v1556_v28 = vor.u32 %v1624_v26, %v1555_v25  ;;  %v1528_v12 = vor.u32 %v1614_v10, %v1525_v11  ;;  %v1499_v13 = vld [vmem:[#allocation3 + $0x80] sm:$0xf]  ;;  %v1607_v26 = vld [vmem:[#allocation3 + $0x6c] sm:$0xf0] }
  0x2f   : > { %v1483_v25 = vld [vmem:[#allocation3 + $0x60] sm:$0xf] }
  0x31   : > { %894 = vmatpush.bf16.msra.mxu3 %v1591_v14  ;;  %v1611_v14 = vld [vmem:[#allocation3 + $0x8c] sm:$0xf0] }
  0x32   : > { %1333 = vmatmul.msk.bf16.vlgmr.msrb.gmra.mxu0 %vm426_vm0, %v448_v17  ;;  %v1590_v17 = vld [vmem:[%s2093_s7 + $0x30] sm:$0xff]  ;;  %850 = vmatpush.bf16.msra.mxu2 %v1584_v16  ;;  %v1500_v16 = vor.u32 %v1611_v14, %v1499_v13  ;;  %v1686_v14 = vld [vmem:[%s2094_s8] ss:$0 sm:$0xff] }
  0x33   : > { %1342 = vmatmul.msk.bf16.vlgmr.msrb.gmra.mxu1 %vm426_vm0, %v562_v29  ;;  %1355 = vmatmul.msk.bf16.vlgmr.msrb.gmra.mxu2 %vm426_vm0, %v405_v15  ;;  %v1588_v15 = vld [vmem:[%s2093_s7 + $0x20] sm:$0xff] }
  0x34   : > { %1368 = vmatmul.msk.bf16.vlgmr.msrb.gmra.mxu3 %vm426_vm0, %v515_v18  ;;  %814 = vmatpush.bf16.msra.mxu1 %v1588_v15  ;;  %v1587_v18 = vld [vmem:[%s2093_s7 + $0x18] sm:$0xff]  ;;  %v1622_v29 = vld [vmem:[#allocation3 + $0xec] sm:$0xf] }
  0x35   : > { %895 = vmatpush.bf16.msra.mxu3 %v1590_v17  ;;  %1115 = vmatpush.bf16.msrb.mxu0 %v1548_v23  ;;  %v1609_v15 = vld [vmem:[#allocation3 + $0x84] sm:$0xf]  ;;  %v1501_v17 = vld [vmem:[#allocation3 + $0x90] sm:$0xf0]  ;;  %v1509_v23 = vld [vmem:[#allocation3 + $0x98] sm:$0xf0] }
  0x36   : > { %1143 = vmatpush.bf16.msrb.mxu2 %v1556_v28  ;;  %v1504_v20 = vor.u32 %v1609_v15, %v1501_v17  ;;  %v1512_v24 = vor.u32 %v1610_v22, %v1509_v23  ;;  %v1484_v28 = vor.u32 %v1607_v26, %v1483_v25  ;;  %v945_v25 = vld [vmem:[%s2096_s10] sm:$0xf] }
  0x37   : > { %v947_v26 = vperm.slane %v945_v25, 0 }
  0x38   : > { %815 = vmatpush.bf16.msra.mxu1 %v1587_v18  ;;  %v1507_v18 = vld [vmem:[#allocation3 + $0x88] sm:$0xf] }
  0x3c   : > { %1129 = vmatpush.bf16.msrb.mxu1 %v1552_v27  ;;  %v1605_v27 = vld [vmem:[#allocation3 + $0x64] sm:$0xf] }
  0x42   : > { %1381 = vmatmul.msk.bf16.vlgmr.msra.gmra.mxu0 %vm426_vm0, %v695_v32  ;;  %v1560_v32 = vor.u32 %v1622_v29, %v1557_v30  ;;  %v1485_v29 = vld [vmem:[#allocation3 + $0x70] sm:$0xf0]  ;;  %v1491_v30 = vld [vmem:[#allocation3 + $0x68] sm:$0xf] }
  0x44   : > { %1157 = vmatpush.bf16.msrb.mxu3 %v1560_v32  ;;  %v1608_v32 = vld [vmem:[#allocation3 + $0x74] sm:$0xf0] }
  0x9f   : > { %v1990_v33 = vpop.f32.mrf.mxu0 }
  0xa0   : > { %v479_v34 = vpop.f32.mrf.mxu1 }
  0xa6   : > { %v508_v35 = vpop.f32.mrf.mxu2 }
  0xa7   : > { %v545_v36 = vpop.f32.mrf.mxu3  ;;  %v509_v37 = vadd.f32 %v508_v35, %v479_v34  ;;  %v1992_v38 = vpop.f32.mrf.mxu0  ;;  %v1619_v34 = vld [vmem:[#allocation3 + $0xcc] sm:$0xf0]  ;;  %v1617_v35 = vld [vmem:[#allocation3 + $0xc4] sm:$0xf] }
  0xa8   : > { %v481_v41 = vpop.f32.mrf.mxu1 }
  0xa9   : > { %v550_v40 = vadd.f32 %v545_v36, %v509_v37  ;;  %v1533_v36 = vld [vmem:[#allocation3 + $0xd0] sm:$0xf0]  ;;  %v1532_v37 = vor.u32 %v1619_v34, %v1531_v31  ;;  %v1488_v31 = vor.u32 %v1605_v27, %v1485_v29  ;;  %v1606_v34 = vld [vmem:[#allocation3 + $0x6c] sm:$0xf]  ;;  %v948_v27 = vperm.slane %v945_v25, 1 }
  0xab   : > { %v556_v42 = vadd.f32 %v1684_v39, %v550_v40  ;;  %v1539_v40 = vld [vmem:[#allocation3 + $0xc8] sm:$0xf]  ;;  %1116 = vmatpush.bf16.msrb.mxu0 %v1532_v37 }
  0xad   : > { %v558_v43 = vmax.f32 %v556_v42, 0.0  ;;  %v1618_v42 = vld [vmem:[#allocation3 + $0xcc] sm:$0xf] }
  0xae   : > { %v510_v44 = vpop.f32.mrf.mxu2 }
  0xaf   : > { %v511_v45 = vadd.f32 %v510_v44, %v481_v41  ;;  %742 = vrot.lane.b32.xlu0 %v558_v43, %s1788_s30  ;;  %v593_v46 = vpop.f32.mrf.mxu0  ;;  %v547_v47 = vpop.f32.mrf.mxu3  ;;  %v1620_v41 = vld [vmem:[#allocation3 + $0xd4] sm:$0xf0]  ;;  %v440_v43 = vadd.f32 %v1683_v19, %v1990_v33 }
  0xb0   : > { %v622_v50 = vpop.f32.mrf.mxu1  ;;  %v1540_v44 = vor.u32 %v1620_v41, %v1539_v40  ;;  %v1603_v40 = vld [vmem:[#allocation3 + $0x4c] sm:$0xf0]  ;;  %v1601_v41 = vld [vmem:[#allocation3 + $0x44] sm:$0xf] }
  0xb1   : > { %v551_v48 = vadd.f32 %v547_v47, %v511_v45  ;;  %v623_v54 = vadd.f32 %v622_v50, %v593_v46  ;;  %v1541_v45 = vld [vmem:[#allocation3 + $0xd8] sm:$0xf0] }
  0xb2   : > { %v1544_v47 = vor.u32 %v1618_v42, %v1541_v45  ;;  %1144 = vmatpush.bf16.msrb.mxu2 %v1540_v44  ;;  %v1475_v44 = vld [vmem:[#allocation3 + $0x48] sm:$0xf]  ;;  %v1604_v45 = vld [vmem:[#allocation3 + $0x54] sm:$0xf0] }
  0xb3   : > { %v557_v49 = vadd.f32 %v1684_v39, %v551_v48  ;;  %v1536_v39 = vor.u32 %v1617_v35, %v1533_v36  ;;  %v444_v48 = vmax.f32 %v440_v43, 0.0  ;;  %v1493_v35 = vld [vmem:[#allocation3 + $0x78] sm:$0xf0]  ;;  %v1492_v36 = vor.u32 %v1608_v32, %v1491_v30  ;;  %v1469_v43 = vld [vmem:[#allocation3 + $0x50] sm:$0xf0] }
  0xb4   : > { %1158 = vmatpush.bf16.msrb.mxu3 %v1544_v47  ;;  %v1496_v37 = vor.u32 %v1606_v34, %v1493_v35  ;;  %v1476_v47 = vor.u32 %v1604_v45, %v1475_v44  ;;  %v949_v32 = vperm.slane %v945_v25, 2  ;;  %v950_v34 = vperm.slane %v945_v25, 3 }
  0xb5   : > { %v559_v51 = vmax.f32 %v557_v49, 0.0  ;;  %1130 = vmatpush.bf16.msrb.mxu1 %v1536_v39  ;;  %v1467_v39 = vld [vmem:[#allocation3 + $0x40] sm:$0xf] }
  0xb6   : > { %v653_v52 = vpop.f32.mrf.mxu2  ;;  %v1468_v42 = vor.u32 %v1603_v40, %v1467_v39 }
  0xb7   : > { %744 = vrot.lane.b32.xlu0 %v559_v51, %s1788_s30  ;;  %v595_v53 = vpop.f32.mrf.mxu0  ;;  %v658_v55 = vadd.f32 %v653_v52, %v623_v54  ;;  %v686_v56 = vpop.f32.mrf.mxu3  ;;  %v442_v52 = vadd.f32 %v1683_v19, %v1992_v38  ;;  %v1515_v38 = vld [vmem:[#allocation3 + $0xa0] sm:$0xf]  ;;  %v1612_v19 = vld [vmem:[#allocation3 + $0x94] sm:$0xf0]  ;;  %s1625_s30 = sshll.u32 %s1873_s21, 6  ;;  %s1180_s21 = scalar_lea.sflag [#allocation5], %s394_s14 }
  0xb8   : > { %v624_v57 = vpop.f32.mrf.mxu1  ;;  %1159 = vmatpush.bf16.msrb.mxu3 %v1528_v12  ;;  %v1508_v21 = vor.u32 %v1612_v19, %v1507_v18  ;;  %s1191_s13 = scalar_lea.hbm %s2097_s11, %s1625_s30 }
  0xb9   : > { %v691_v58 = vadd.f32 %v686_v56, %v658_v55  ;;  %v625_v62 = vadd.f32 %v624_v57, %v595_v53  ;;  %v445_v53 = vmax.f32 %v442_v52, 0.0  ;;  %v1599_v52 = vld [vmem:[#allocation3 + $0x2c] sm:$0xf0]  ;;  %s1194_s15 = sshll.u32 %s1191_s13, 4  ;;  %s1195_s15 = int_to_ptr.hbm [resolvable:$true] %s1194_s15 }
  0xba   : > { %s1731_s16 = sshra.s32 %s1195_s15, 4  ;;  %s1732_s16 = int_to_ptr.hbm [resolvable:$true] %s1731_s16 }
  0xbb   : > { %s1733_s22 = scalar_lea.hbm %s1732_s16, 64  ;;  %p1738_p3 = scmp.lt.s32.totalorder %s1732_s16, %s2097_s11 }
  0xbc   : > { %1160 = vmatpush.bf16.msrb.mxu3 %v1512_v24  ;;  %p1734_p0 = scmp.ne.s32.totalorder %s1732_s16, %s1733_s22  ;;  %p1739_p4 = scmp.lt.s32.totalorder %s1737_s25, %s1733_s22 }
  0xbe   : > { %v655_v60 = vpop.f32.mrf.mxu2  ;;  %p1735_p1 = pnand %p1734_p0, %p1890_p5  ;;  %p1740_p7 = por %p1739_p4, %p1738_p3 }
  0xbf   : > { %v725_v61 = vpop.f32.mrf.mxu0  ;;  %v659_v0 = vadd.f32 %v655_v60, %v625_v62  ;;  %v688_v3 = vpop.f32.mrf.mxu3 }
  0xc0   : > { %v730_v63 = vadd.f32 %v725_v61, %v691_v58  ;;  %1161 = vmatpush.bf16.msrb.mxu3 %v1496_v37  ;;  %p1736_p2 = pneg %p1735_p1 }
  0xc1   : > { %v692_v4 = vadd.f32 %v688_v3, %v659_v0  ;;  %v1613_v3 = vld [vmem:[#allocation3 + $0xa4] sm:$0xf] }
  0xc2   : > { %v736_v1 = vadd.f32 %v1685_v59, %v730_v63  ;;  %p1741_p8 = pnand %p1740_p7, %p1736_p2 }
  0xc4   : > { %v738_v2 = vmax.f32 %v736_v1, 0.0 }
  0xc6   : > { %750 = vrot.lane.b32.xlu1 %v738_v2, %s2098_s29  ;;  %v1615_v2 = vld [vmem:[#allocation3 + $0xac] sm:$0xf0] }
  0xc7   : > { %v727_v5 = vpop.f32.mrf.mxu0 }
  0xc8   : > { %v731_v6 = vadd.f32 %v727_v5, %v692_v4  ;;  %v1516_v4 = vor.u32 %v1615_v2, %v1515_v38  ;;  %v1517_v5 = vld [vmem:[#allocation3 + $0xb0] sm:$0xf0]  ;;  %v1443_v2 = vld [vmem:[#allocation3 + $0x8] sm:$0xf] }
  0xc9   : > { %v1437_v38 = vld [vmem:[#allocation3 + $0x10] sm:$0xf0] }
  0xca   : > { %v737_v7 = vadd.f32 %v1685_v59, %v731_v6  ;;  %v1523_v6 = vld [vmem:[#allocation3 + $0xa8] sm:$0xf]  ;;  %1117 = vmatpush.bf16.msrb.mxu0 %v1516_v4 }
  0xcc   : > { %v739_v8 = vmax.f32 %v737_v7, 0.0  ;;  %v1616_v7 = vld [vmem:[#allocation3 + $0xb4] sm:$0xf0] }
  0xcd   : > { %v1524_v9 = vor.u32 %v1616_v7, %v1523_v6  ;;  %v1594_v6 = vld [vmem:[#allocation3 + $0xc] sm:$0xf]  ;;  %v1445_v7 = vld [vmem:[#allocation3 + $0x18] sm:$0xf0] }
  0xce   : > { %752 = vrot.lane.b32.xlu1 %v739_v8, %s2098_s29  ;;  %v1520_v8 = vor.u32 %v1613_v3, %v1517_v5  ;;  %1118 = vmatpush.bf16.msrb.mxu0 %v1500_v16  ;;  %v1596_v3 = vld [vmem:[#allocation3 + $0x14] sm:$0xf0] }
  0xcf   : > { %1145 = vmatpush.bf16.msrb.mxu2 %v1524_v9  ;;  %v1444_v5 = vor.u32 %v1596_v3, %v1443_v2 }
  0xd0   : > { %1131 = vmatpush.bf16.msrb.mxu1 %v1520_v8  ;;  %v1448_v8 = vor.u32 %v1594_v6, %v1445_v7 }
  0xd2   : > { %1119 = vmatpush.bf16.msrb.mxu0 %v1484_v28 }
  0xd3   : > { %1146 = vmatpush.bf16.msrb.mxu2 %v1508_v21 }
  0xd4   : > { %1132 = vmatpush.bf16.msrb.mxu1 %v1504_v20 }
  0xd6   : > { %1120 = vmatpush.bf16.msrb.mxu0 %v1468_v42 }
  0xd7   : > { %1147 = vmatpush.bf16.msrb.mxu2 %v1492_v36 }
  0xd8   : > { %1133 = vmatpush.bf16.msrb.mxu1 %v1488_v31 }
  0xdb   : > { %1148 = vmatpush.bf16.msrb.mxu2 %v1476_v47 }
 0x121   : > { %v743_v46 = vpop.permute.xlu0 %742 }
 0x122   : > { %v757_v49 = vsel %vm756_vm3, %v444_v48, %v743_v46  ;;  %v1472_v46 = vor.u32 %v1601_v41, %v1469_v43  ;;  %v1602_v48 = vld [vmem:[#allocation3 + $0x4c] sm:$0xf] }
 0x124   : > { %1134 = vmatpush.bf16.msrb.mxu1 %v1472_v46 }
 0x129   : > { %v745_v33 = vpop.permute.xlu0 %744 }
 0x12a   : > { %v758_v54 = vsel %vm756_vm3, %v445_v53, %v745_v33  ;;  %v1597_v33 = vld [vmem:[#allocation3 + $0x24] sm:$0xf] }
 0x138   : > { %v751_v50 = vpop.permute.xlu1 %750 }
 0x139   : > { %v759_v51 = vsel %vm426_vm0, %v757_v49, %v751_v50  ;;  %v1477_v49 = vld [vmem:[#allocation3 + $0x58] sm:$0xf0] }
 0x13a   : > { %766 = vst.msk [vmem:[#allocation2 + $0x1] sm:$0xff] %vm761_vm1, %v759_v51  ;;  %v1480_v50 = vor.u32 %v1602_v48, %v1477_v49  ;;  %v1451_v51 = vld [vmem:[#allocation3 + $0x20] sm:$0xf] }
 0x13b   : > { %v1452_v53 = vor.u32 %v1599_v52, %v1451_v51 }
 0x13c   : > { %1162 = vmatpush.bf16.msrb.mxu3 %v1480_v50 }
 0x13d   : > { %1121 = vmatpush.bf16.msrb.mxu0 %v1452_v53 }
 0x140   : > { %v753_v55 = vpop.permute.xlu1 %752 }
 0x141   : > { %v760_v56 = vsel %vm426_vm0, %v758_v54, %v753_v55  ;;  %v777_v57 = vld [vmem:[#allocation2 + $0x1] sm:$0xff]  ;;  %v1453_v54 = vld [vmem:[#allocation3 + $0x30] sm:$0xf0] }
 0x142   : > { %767 = vst.msk [vmem:[#allocation2 + $0x9] sm:$0xff] %vm761_vm1, %v760_v56  ;;  %v768_v58 = vld [vmem:[#allocation2] sm:$0xff]  ;;  %v1600_v56 = vld [vmem:[#allocation3 + $0x34] sm:$0xf0] }
 0x143   : > { %v1459_v55 = vld [vmem:[#allocation3 + $0x28] sm:$0xf] }
 0x149   : > { %v778_v59 = vld [vmem:[#allocation2 + $0x9] sm:$0xff] }
 0x14a   : > { %v769_v60 = vld [vmem:[#allocation2 + $0x8] sm:$0xff]  ;;  %v779_v62 = vpack.c.bf16 %v778_v59, %v777_v57  ;;  %v1456_v57 = vor.u32 %v1597_v33, %v1453_v54  ;;  %v1598_v59 = vld [vmem:[#allocation3 + $0x2c] sm:$0xf] }
 0x14b   : > { %v857_v61 = vld [vmem:[#allocation2 + $0x2] sm:$0xff]  ;;  %v770_v63 = vpack.c.bf16 %v769_v60, %v768_v58  ;;  %v858_v0 = vld [vmem:[#allocation2 + $0xa] sm:$0xff]  ;;  %v1460_v58 = vor.u32 %v1600_v56, %v1459_v55  ;;  %v1461_v60 = vld [vmem:[#allocation3 + $0x38] sm:$0xf0] }
 0x14c   : > { %v859_v1 = vpack.c.bf16 %v858_v0, %v857_v61  ;;  %1400 = vmatmul.msk.bf16.vlgmr.msra.gmra.mxu1 %vm761_vm1, %v779_v62  ;;  %v1464_v61 = vor.u32 %v1598_v59, %v1461_v60  ;;  %v1435_v62 = vld [vmem:[#allocation3] sm:$0xf]  ;;  %v1593_v0 = vld [vmem:[#allocation3 + $0x4] sm:$0xf] }
 0x14d   : > { %1413 = vmatmul.msk.bf16.vlgmr.msra.gmra.mxu2 %vm761_vm1, %v770_v63  ;;  %1135 = vmatpush.bf16.msrb.mxu1 %v1456_v57  ;;  %v1595_v63 = vld [vmem:[#allocation3 + $0xc] sm:$0xf0]  ;;  %v1440_v4 = vor.u32 %v1593_v0, %v1437_v38 }
 0x14e   : > { %1432 = vmatmul.msk.bf16.vlgmr.msra.gmra.mxu3 %vm761_vm1, %v859_v1  ;;  %1149 = vmatpush.bf16.msrb.mxu2 %v1460_v58  ;;  %v1436_v1 = vor.u32 %v1595_v63, %v1435_v62 }
 0x14f   : > { %1163 = vmatpush.bf16.msrb.mxu3 %v1464_v61 }
 0x150   : > { %1122 = vmatpush.bf16.msrb.mxu0 %v1436_v1 }
 0x151   : > { %1136 = vmatpush.bf16.msrb.mxu1 %v1440_v4 }
 0x152   : > { %1150 = vmatpush.bf16.msrb.mxu2 %v1444_v5 }
 0x153   : > { %1164 = vmatpush.bf16.msrb.mxu3 %v1448_v8 }
 0x1c9   : > { %v817_v9 = vpop.f32.mrf.mxu1 }
 0x1d0   : > { %v852_v10 = vpop.f32.mrf.mxu2 }
 0x1d1   : > { %v897_v11 = vpop.f32.mrf.mxu3  ;;  %v853_v12 = vadd.f32 %v852_v10, %v817_v9  ;;  %v819_v15 = vpop.f32.mrf.mxu1 }
 0x1d3   : > { %v902_v13 = vadd.f32 %v897_v11, %v853_v12 }
 0x1d5   : > { %v908_v19 = vadd.f32 %v1686_v14, %v902_v13 }
 0x1d7   : > { %v910_v22 = vmax.f32 %v908_v19, 0.0 }
 0x1d8   : > { %v854_v16 = vpop.f32.mrf.mxu2 }
 0x1d9   : > { %v855_v17 = vadd.f32 %v854_v16, %v819_v15  ;;  %v899_v18 = vpop.f32.mrf.mxu3 }
 0x1db   : > { %v903_v20 = vadd.f32 %v899_v18, %v855_v17 }
 0x1dd   : > { %v909_v21 = vadd.f32 %v1686_v14, %v903_v20 }
 0x1df   : > { %v911_v23 = vmax.f32 %v909_v21, 0.0 }
 0x1e1   : > { %v912_v24 = vpack.c.bf16 %v911_v23, %v910_v22 }
 0x1e3   : > { %1123 = vmatmul.bf16.vlgmr.msrb.gmra.mxu0 %v912_v24  ;;  %1137 = vmatmul.bf16.vlgmr.msrb.gmra.mxu1 %v912_v24 }
 0x1e4   : > { %1151 = vmatmul.bf16.vlgmr.msrb.gmra.mxu2 %v912_v24  ;;  %1165 = vmatmul.bf16.vlgmr.msrb.gmra.mxu3 %v912_v24 }
 0x260   : > { %v1124_v28 = vpop.f32.mrf.mxu0  ;;  %v1138_v29 = vpop.f32.mrf.mxu1 }
 0x261   : > { %v1125_v30 = vadd.f32 %v1124_v28, %v947_v26  ;;  %v1139_v31 = vadd.f32 %v1138_v29, %v948_v27 }
 0x263   : > { %1171 = vst [vmem:[%s396_s24] sm:$0xff] %v1125_v30 }
 0x264   : > { %1172 = vst [vmem:[%s396_s24 + $0x8] sm:$0xff] %v1139_v31 }
 0x267   : > { %v1152_v35 = vpop.f32.mrf.mxu2  ;;  %v1166_v36 = vpop.f32.mrf.mxu3 }
 0x268   : > { %v1153_v37 = vadd.f32 %v1152_v35, %v949_v32  ;;  %v1167_v39 = vadd.f32 %v1166_v36, %v950_v34  ;;  %v1126_v40 = vpop.f32.mrf.mxu0  ;;  %v1140_v41 = vpop.f32.mrf.mxu1 }
 0x269   : > { %v1127_v42 = vadd.f32 %v1126_v40, %v947_v26  ;;  %v1141_v43 = vadd.f32 %v1140_v41, %v948_v27 }
 0x26a   : > { %1173 = vst [vmem:[%s396_s24 + $0x10] sm:$0xff] %v1153_v37 }
 0x26b   : > { %1174 = vst [vmem:[%s396_s24 + $0x18] sm:$0xff] %v1167_v39 }
 0x26c   : > { %1175 = vst [vmem:[%s396_s24 + $0x20] sm:$0xff] %v1127_v42 }
 0x26d   : > { %1176 = vst [vmem:[%s396_s24 + $0x28] sm:$0xff] %v1141_v43 }
 0x26f   : > { %v1154_v44 = vpop.f32.mrf.mxu2  ;;  %v1168_v45 = vpop.f32.mrf.mxu3 }
 0x270   : > { %v1155_v46 = vadd.f32 %v1154_v44, %v949_v32  ;;  %v1169_v47 = vadd.f32 %v1168_v45, %v950_v34 }
 0x272   : > { %1177 = vst [vmem:[%s396_s24 + $0x30] sm:$0xff] %v1155_v46 }
 0x273   : > { %1178 = vst [vmem:[%s396_s24 + $0x38] sm:$0xff] %v1169_v47 }
 0x274   : > { %1744 = shalt.err (!%p1741_p8)
}
 0x275   : > { %s1791_s14 = smov 512   ;;  %s2103_s24 = smov 32  }
 0x276   : > { %1631 = dma.vmem_to_hbm [thread:$0]  (%p1890_p5), %s1193_s12, 1024, %s1195_s15, %s1180_s21, %s1791_s14, %s1791_s14, %s2103_s24  }
 0x277 PF: > { %p1643_p9 = scmp.ge.s32.totalorder %s1783_s20, 2  ;;  %s1209_s30 = sand.u32 1, %s1771_s17  }
 0x278   : > { %s1210_s29 = scalar_lea.sflag [#allocation5], %s1209_s30 }
 0x279   : > { %p1638_p10 = pnand %p1643_p9, %p1894_p6 }
 0x27b   : > { %p1639_p11 = pneg %p1638_p10 }
 0x27d   : > { %1766 = dma.done.wait (%p1639_p11), %s1210_s29, 1024  }
 0x27e   : > { %1768 = vsyncadd (%p1639_p11), %s1210_s29, 4294966272  ;;  %p22_p12 = scmp.ge.s32.totalorder %s1877_s23, 4   ;;  %s2104_s17 = smov %s1775_s18 }
 0x27f   : > { %s2105_s18 = smov %s1779_s19  ;;  %s2106_s19 = smov %s1888_s26 }
 0x280   : > { %s2107_s20 = smov %s1877_s23  ;;  %24 = sbr.rel (!%p22_p12) target bundleno = 6 (0x6), region = 112 }
 0x285   :  { %1216 = vsyncpa [#allocation4], 1 }
 0x286   :  { %1218 = vsyncpa [#allocation4 + $0x1], 1 }
 0x287   :  { %1219 = vsyncpa [#allocation5], 1 }
 0x288   :  { %1221 = vsyncpa [#allocation5 + $0x1], 1 }

</bundles_post_ra>
